<compile_context>
chip_gen: v7x
topology: tpu7x:2x2x1
jax: 0.10.0
libtpu: 0.0.40
codegen_flags: <defaults>
</compile_context>

<pallas_src>
import jax
import jax.numpy as jnp
from jax.experimental import pallas as pl
from jax.experimental.pallas import tpu as pltpu


def graph_decoder_kernel(ba_ref, bt_ref, bu_ref,      # [1, N_t] int32, nodes on lanes
                         xa_ref, xt_ref, xu_ref,      # [N_t, 1+C] f32 (ones col | features)
                         wa_ref, wt_ref, wu_ref,      # [1+C, O] f32 (zero row ; W_t^T)
                         b_ref,                       # [1, O]   f32 bias
                         out_ref):                    # [G, O]   f32 output
    G = out_ref.shape[0]

    def pooled_linear(batch_ref, x_ref, w_ref):
        N = x_ref.shape[0]
        # Lane-dense one-hot graph membership: onehot[g, n] = (batch[n] == g)
        gids = jax.lax.broadcasted_iota(jnp.int32, (G, N), 0)             # [G, N]
        onehot = (batch_ref[...] == gids).astype(jnp.float32)             # [G, N]
        # One MXU dot gives per-graph counts (col 0) AND feature sums (cols 1..C)
        sums = jnp.dot(onehot, x_ref[...],
                       preferred_element_type=jnp.float32)                # [G, 1+C]
        # EUP reciprocal of counts; empty graph -> mean 0 (matches reference)
        inv = pl.reciprocal(jnp.maximum(sums[:, 0:1], 1.0), approx=True)  # [G, 1]
        # Fused Linear block; the leading zero row of w kills the counts column.
        lin = jnp.dot(sums, w_ref[...],
                      preferred_element_type=jnp.float32)                 # [G, O]
        # Row scaling commutes with the right-multiplication -> scale the small [G, O].
        return inv * lin

    # TODO(synk): dropout(p=0.2) is identity here (eval mode / training=False);
    # a training-mode kernel would need pltpu.prng_seed + Bernoulli mask + 1/(1-p).
    out_ref[...] = (pooled_linear(ba_ref, xa_ref, wa_ref)
                    + pooled_linear(bt_ref, xt_ref, wt_ref)
                    + pooled_linear(bu_ref, xu_ref, wu_ref)
                    + b_ref[...])                                         # [G, O]


def graph_decoder(x_dict, batch_dict, weight, bias, num_graphs):
    """x_dict/batch_dict keyed by 'article','tweet','user'. weight: [O, 3C]."""
    out_channels, in3 = weight.shape
    C = in3 // 3
    w = weight.astype(jnp.float32)

    def prep_batch(b):
        return b.astype(jnp.int32).reshape(1, -1)          # nodes on the lane axis

    def prep_x(x):
        x = x.astype(jnp.float32)
        ones = jnp.ones((x.shape[0], 1), jnp.float32)      # counts column (fused into pool dot)
        return jnp.concatenate([ones, x], axis=1)          # [N, 1+C]

    def prep_w(t):
        wt = w[:, t * C:(t + 1) * C].T                     # pre-split + pre-T: [C, O]
        zero = jnp.zeros((1, out_channels), jnp.float32)   # annihilates the counts column
        return jnp.concatenate([zero, wt], axis=0)         # [1+C, O]

    ba, bt, bu = (prep_batch(batch_dict[k]) for k in ('article', 'tweet', 'user'))
    xa, xt, xu = (prep_x(x_dict[k]) for k in ('article', 'tweet', 'user'))
    wa, wt_, wu = (prep_w(t) for t in range(3))
    b2d = bias.reshape(1, -1).astype(jnp.float32)

    vmem = pl.BlockSpec(memory_space=pltpu.MemorySpace.VMEM)
    return pl.pallas_call(
        graph_decoder_kernel,
        out_shape=jax.ShapeDtypeStruct((num_graphs, out_channels), jnp.float32),
        in_specs=[vmem] * 10,
        out_specs=vmem,
    )(ba, bt, bu, xa, xt, xu, wa, wt_, wu, b2d)


def reference(x_dict, batch_dict, weight, bias, num_graphs):
    """Pure-JAX reference for correctness check."""
    def pool(x, b):
        sums = jax.ops.segment_sum(x, b, num_segments=num_graphs)
        cnt = jax.ops.segment_sum(jnp.ones((x.shape[0],), x.dtype), b,
                                  num_segments=num_graphs)
        return sums / jnp.maximum(cnt, 1.0)[:, None]

    xcat = jnp.concatenate([pool(x_dict['article'], batch_dict['article']),
                            pool(x_dict['tweet'], batch_dict['tweet']),
                            pool(x_dict['user'], batch_dict['user'])], axis=1)
    return xcat @ weight.T + bias


if __name__ == "__main__":
    key = jax.random.PRNGKey(0)
    in_channels = 32
    out_channels = 16
    num_graphs = 4
    n_nodes = {'article': 24, 'tweet': 40, 'user': 56}

    keys = jax.random.split(key, 8)
    x_dict = {
        'article': jax.random.normal(keys[0], (n_nodes['article'], in_channels), jnp.float32),
        'tweet':   jax.random.normal(keys[1], (n_nodes['tweet'],   in_channels), jnp.float32),
        'user':    jax.random.normal(keys[2], (n_nodes['user'],    in_channels), jnp.float32),
    }
    batch_dict = {
        'article': jnp.sort(jax.random.randint(keys[3], (n_nodes['article'],), 0, num_graphs)),
        'tweet':   jnp.sort(jax.random.randint(keys[4], (n_nodes['tweet'],),   0, num_graphs)),
        'user':    jnp.sort(jax.random.randint(keys[5], (n_nodes['user'],),    0, num_graphs)),
    }

    # Deterministic Linear(in_channels*3 -> out_channels) params (PyTorch-style uniform bound)
    bound = 1.0 / jnp.sqrt(jnp.float32(in_channels * 3))
    weight = jax.random.uniform(keys[6], (out_channels, in_channels * 3),
                                jnp.float32, -bound, bound)
    bias = jax.random.uniform(keys[7], (out_channels,), jnp.float32, -bound, bound)

    out = graph_decoder(x_dict, batch_dict, weight, bias, num_graphs)
    out = jax.block_until_ready(out)

    ref = reference(x_dict, batch_dict, weight, bias, num_graphs)
    assert out.shape == (num_graphs, out_channels)
    # Tolerance covers the EUP approx reciprocal (rel err ~1e-4 on 1/count).
    assert jnp.allclose(out, ref, atol=2e-3, rtol=2e-3), \
        f"max abs diff {jnp.max(jnp.abs(out - ref))}"

    print("KERNEL_OK")
</pallas_src>

<mosaic_0001>
module attributes {stable_mosaic.version = 11 : i64} {
  func.func @graph_decoder_kernel(%arg0: memref<1x24xi32, #tpu.memory_space<vmem>>, %arg1: memref<1x40xi32, #tpu.memory_space<vmem>>, %arg2: memref<1x56xi32, #tpu.memory_space<vmem>>, %arg3: memref<24x33xf32, #tpu.memory_space<vmem>>, %arg4: memref<40x33xf32, #tpu.memory_space<vmem>>, %arg5: memref<56x33xf32, #tpu.memory_space<vmem>>, %arg6: memref<33x16xf32, #tpu.memory_space<vmem>>, %arg7: memref<33x16xf32, #tpu.memory_space<vmem>>, %arg8: memref<33x16xf32, #tpu.memory_space<vmem>>, %arg9: memref<1x16xf32, #tpu.memory_space<vmem>>, %arg10: memref<4x16xf32, #tpu.memory_space<vmem>>) attributes {dimension_semantics = [], scalar_prefetch = 0 : i64, scratch_operands = 0 : i64, tpu.core_type = #tpu.core_type<tc>} {
    %0 = tpu.iota {dimensions = array<i32: 0>} : vector<4x24xi32>
    %c0 = arith.constant 0 : index
    %c0_0 = arith.constant 0 : index
    %1 = vector.load %arg0[%c0, %c0_0] : memref<1x24xi32, #tpu.memory_space<vmem>>, vector<1x24xi32>
    %2 = vector.broadcast %1 : vector<1x24xi32> to vector<4x24xi32>
    %3 = arith.cmpi eq, %2, %0 : vector<4x24xi32>
    %4 = arith.extui %3 : vector<4x24xi1> to vector<4x24xi32>
    %5 = arith.sitofp %4 : vector<4x24xi32> to vector<4x24xf32>
    %c0_1 = arith.constant 0 : index
    %c0_2 = arith.constant 0 : index
    %6 = vector.load %arg3[%c0_1, %c0_2] : memref<24x33xf32, #tpu.memory_space<vmem>>, vector<24x33xf32>
    %cst = arith.constant dense<0.000000e+00> : vector<4x33xf32>
    %7 = tpu.matmul %5, %6, %cst {dimension_numbers = #tpu.dot_dimension_numbers<[1], [0], [0], [1], [0, 0, 1, 1], [], []>} : vector<4x24xf32>, vector<24x33xf32>, vector<4x33xf32> -> vector<4x33xf32>
    %8 = vector.extract_strided_slice %7 {offsets = [0, 0], sizes = [4, 1], strides = [1, 1]} : vector<4x33xf32> to vector<4x1xf32>
    %cst_3 = arith.constant 1.000000e+00 : f32
    %9 = vector.broadcast %cst_3 : f32 to vector<4x1xf32>
    %10 = arith.maximumf %8, %9 : vector<4x1xf32>
    %11 = tpu.reciprocal %10 {approx = true} : vector<4x1xf32> -> vector<4x1xf32>
    %c0_4 = arith.constant 0 : index
    %c0_5 = arith.constant 0 : index
    %12 = vector.load %arg6[%c0_4, %c0_5] : memref<33x16xf32, #tpu.memory_space<vmem>>, vector<33x16xf32>
    %cst_6 = arith.constant dense<0.000000e+00> : vector<4x16xf32>
    %13 = tpu.matmul %7, %12, %cst_6 {dimension_numbers = #tpu.dot_dimension_numbers<[1], [0], [0], [1], [0, 0, 1, 1], [], []>} : vector<4x33xf32>, vector<33x16xf32>, vector<4x16xf32> -> vector<4x16xf32>
    %14 = vector.broadcast %11 : vector<4x1xf32> to vector<4x16xf32>
    %15 = arith.mulf %14, %13 : vector<4x16xf32>
    %16 = tpu.iota {dimensions = array<i32: 0>} : vector<4x40xi32>
    %c0_7 = arith.constant 0 : index
    %c0_8 = arith.constant 0 : index
    %17 = vector.load %arg1[%c0_7, %c0_8] : memref<1x40xi32, #tpu.memory_space<vmem>>, vector<1x40xi32>
    %18 = vector.broadcast %17 : vector<1x40xi32> to vector<4x40xi32>
    %19 = arith.cmpi eq, %18, %16 : vector<4x40xi32>
    %20 = arith.extui %19 : vector<4x40xi1> to vector<4x40xi32>
    %21 = arith.sitofp %20 : vector<4x40xi32> to vector<4x40xf32>
    %c0_9 = arith.constant 0 : index
    %c0_10 = arith.constant 0 : index
    %22 = vector.load %arg4[%c0_9, %c0_10] : memref<40x33xf32, #tpu.memory_space<vmem>>, vector<40x33xf32>
    %cst_11 = arith.constant dense<0.000000e+00> : vector<4x33xf32>
    %23 = tpu.matmul %21, %22, %cst_11 {dimension_numbers = #tpu.dot_dimension_numbers<[1], [0], [0], [1], [0, 0, 1, 1], [], []>} : vector<4x40xf32>, vector<40x33xf32>, vector<4x33xf32> -> vector<4x33xf32>
    %24 = vector.extract_strided_slice %23 {offsets = [0, 0], sizes = [4, 1], strides = [1, 1]} : vector<4x33xf32> to vector<4x1xf32>
    %cst_12 = arith.constant 1.000000e+00 : f32
    %25 = vector.broadcast %cst_12 : f32 to vector<4x1xf32>
    %26 = arith.maximumf %24, %25 : vector<4x1xf32>
    %27 = tpu.reciprocal %26 {approx = true} : vector<4x1xf32> -> vector<4x1xf32>
    %c0_13 = arith.constant 0 : index
    %c0_14 = arith.constant 0 : index
    %28 = vector.load %arg7[%c0_13, %c0_14] : memref<33x16xf32, #tpu.memory_space<vmem>>, vector<33x16xf32>
    %cst_15 = arith.constant dense<0.000000e+00> : vector<4x16xf32>
    %29 = tpu.matmul %23, %28, %cst_15 {dimension_numbers = #tpu.dot_dimension_numbers<[1], [0], [0], [1], [0, 0, 1, 1], [], []>} : vector<4x33xf32>, vector<33x16xf32>, vector<4x16xf32> -> vector<4x16xf32>
    %30 = vector.broadcast %27 : vector<4x1xf32> to vector<4x16xf32>
    %31 = arith.mulf %30, %29 : vector<4x16xf32>
    %32 = arith.addf %15, %31 : vector<4x16xf32>
    %33 = tpu.iota {dimensions = array<i32: 0>} : vector<4x56xi32>
    %c0_16 = arith.constant 0 : index
    %c0_17 = arith.constant 0 : index
    %34 = vector.load %arg2[%c0_16, %c0_17] : memref<1x56xi32, #tpu.memory_space<vmem>>, vector<1x56xi32>
    %35 = vector.broadcast %34 : vector<1x56xi32> to vector<4x56xi32>
    %36 = arith.cmpi eq, %35, %33 : vector<4x56xi32>
    %37 = arith.extui %36 : vector<4x56xi1> to vector<4x56xi32>
    %38 = arith.sitofp %37 : vector<4x56xi32> to vector<4x56xf32>
    %c0_18 = arith.constant 0 : index
    %c0_19 = arith.constant 0 : index
    %39 = vector.load %arg5[%c0_18, %c0_19] : memref<56x33xf32, #tpu.memory_space<vmem>>, vector<56x33xf32>
    %cst_20 = arith.constant dense<0.000000e+00> : vector<4x33xf32>
    %40 = tpu.matmul %38, %39, %cst_20 {dimension_numbers = #tpu.dot_dimension_numbers<[1], [0], [0], [1], [0, 0, 1, 1], [], []>} : vector<4x56xf32>, vector<56x33xf32>, vector<4x33xf32> -> vector<4x33xf32>
    %41 = vector.extract_strided_slice %40 {offsets = [0, 0], sizes = [4, 1], strides = [1, 1]} : vector<4x33xf32> to vector<4x1xf32>
    %cst_21 = arith.constant 1.000000e+00 : f32
    %42 = vector.broadcast %cst_21 : f32 to vector<4x1xf32>
    %43 = arith.maximumf %41, %42 : vector<4x1xf32>
    %44 = tpu.reciprocal %43 {approx = true} : vector<4x1xf32> -> vector<4x1xf32>
    %c0_22 = arith.constant 0 : index
    %c0_23 = arith.constant 0 : index
    %45 = vector.load %arg8[%c0_22, %c0_23] : memref<33x16xf32, #tpu.memory_space<vmem>>, vector<33x16xf32>
    %cst_24 = arith.constant dense<0.000000e+00> : vector<4x16xf32>
    %46 = tpu.matmul %40, %45, %cst_24 {dimension_numbers = #tpu.dot_dimension_numbers<[1], [0], [0], [1], [0, 0, 1, 1], [], []>} : vector<4x33xf32>, vector<33x16xf32>, vector<4x16xf32> -> vector<4x16xf32>
    %47 = vector.broadcast %44 : vector<4x1xf32> to vector<4x16xf32>
    %48 = arith.mulf %47, %46 : vector<4x16xf32>
    %49 = arith.addf %32, %48 : vector<4x16xf32>
    %c0_25 = arith.constant 0 : index
    %c0_26 = arith.constant 0 : index
    %50 = vector.load %arg9[%c0_25, %c0_26] : memref<1x16xf32, #tpu.memory_space<vmem>>, vector<1x16xf32>
    %51 = vector.broadcast %50 : vector<1x16xf32> to vector<4x16xf32>
    %52 = arith.addf %49, %51 : vector<4x16xf32>
    %c0_27 = arith.constant 0 : index
    %c0_28 = arith.constant 0 : index
    %53 = vector.load %arg10[%c0_27, %c0_28] : memref<4x16xf32, #tpu.memory_space<vmem>>, vector<4x16xf32>
    tpu.vector_store %arg10[%c0_27, %c0_28], %52 {strides = array<i32>} : memref<4x16xf32, #tpu.memory_space<vmem>>, vector<4x16xf32>,
    return
  }
}

</mosaic_0001>

<bundles_post_ra>
// kernel: tpu_custom_call.1
= control target key start
LH: loop header
LB: loop body
LE: loop exit
PB: predicated region body
PF: predicated region fallthrough
CT: control target
= control target key end

     0   :  { %v36_v2 = vlaneseq  ;;  %v797_v3 = vmov 0.0|0.0   ;;  %vm798_vm0 = vmmov 0   ;;  %v799_v5 = vmov 0.0   ;;  %s1010_s0 = inlined_call_operand.vmem [shape: s32[1,24], index: 0, kind: input, shape index: {}]   ;;  %s1011_s1 = inlined_call_operand.vmem [shape: s32[1,40], index: 1, kind: input, shape index: {}]   ;;  %s1012_s2 = inlined_call_operand.vmem [shape: s32[1,56], index: 2, kind: input, shape index: {}]   ;;  %s1013_s3 = inlined_call_operand.vmem [shape: f32[24,33], index: 3, kind: input, shape index: {}]   ;;  %s1014_s4 = inlined_call_operand.vmem [shape: f32[40,33], index: 4, kind: input, shape index: {}]   ;;  %s1015_s5 = inlined_call_operand.vmem [shape: f32[56,33], index: 5, kind: input, shape index: {}]   ;;  %s1016_s6 = inlined_call_operand.vmem [shape: f32[33,16], index: 6, kind: input, shape index: {}]   ;;  %s1017_s7 = inlined_call_operand.vmem [shape: f32[33,16], index: 7, kind: input, shape index: {}]   ;;  %s1018_s8 = inlined_call_operand.vmem [shape: f32[33,16], index: 8, kind: input, shape index: {}]   ;;  %s1019_s9 = inlined_call_operand.vmem [shape: f32[1,16], index: 9, kind: input, shape index: {}]   ;;  %s1020_s10 = inlined_call_operand.hbm [shape: f32[4,16], index: 10, kind: output, shape index: {}]  }
   0x1   :  { %v46_v0 = vld [vmem:[%s1013_s3] sm:$0xff]  ;;  %v47_v1 = vld [vmem:[%s1013_s3 + $0x8] sm:$0xff]  ;;  %724 = vmatprep.subr.bf16.mxu0 %v797_v3  ;;  %652 = vmatprep.mubr.msk.f32.mxu0 %vm798_vm0, %v799_v5  ;;  %v48_v10 = vld [vmem:[%s1013_s3 + $0x10] sm:$0xff]  ;;  %vm49_vm2 = vcmask 195584  }
   0x2   :  { %v725_v4 = vpack.c.bf16 %v47_v1, %v46_v0  ;;  %v594_v6 = vld [vmem:[%s1010_s0] ss:$0 sm:$0xff]  ;;  %v37_v7 = vshrl.u32 %v36_v2, 7  ;;  %v223_v9 = vld [vmem:[%s1014_s4 + $0x8] sm:$0xff]  ;;  %727 = vmatprep.subr.bf16.mxu1 %v797_v3  ;;  %665 = vmatprep.mubr.msk.f32.mxu1 %vm798_vm0, %v799_v5  ;;  %v224_v13 = vld [vmem:[%s1014_s4 + $0x10] sm:$0xff] }
   0x3   :  { %v222_v8 = vld [vmem:[%s1014_s4] sm:$0xff]  ;;  %v225_v14 = vld [vmem:[%s1014_s4 + $0x18] sm:$0xff]  ;;  %v126_v16 = vld [vmem:[%s1016_s6 + $0x8] sm:$0xff] }
   0x4   :  { %726 = vmatpush3.bf16.msra.mxu0 %v725_v4  ;;  %vm43_vm1 = vcmp.eq.s32.totalorder %v594_v6, %v37_v7  ;;  %v734_v12 = vpack.c.bf16 %v223_v9, %v222_v8  ;;  %v125_v15 = vld [vmem:[%s1016_s6] sm:$0xff]  ;;  %v127_v18 = vld [vmem:[%s1016_s6 + $0x10] sm:$0xff]  ;;  %v128_v19 = vld [vmem:[%s1016_s6 + $0x18] sm:$0xff] }
   0x5   :  { %650 = vmatprep.subr.mxu0 %v799_v5  ;;  %v595_v11 = vsel %vm43_vm1, 1.0, %v799_v5  ;;  %v728_v17 = vpack.c.bf16 %v126_v16, %v125_v15 }
   0x8   :  { %651 = vmatpush3.msra.mxu0 %v48_v10 }
   0x9   :  { %15 = vsyncpa [#allocation3], 0  ;;  %653 = vmatmul.mubr.msk.f32.vlgmr.msra.gmra.mrb[0].mxu0 %vm49_vm2, %v595_v11  ;;  %733 = vmatprep.subr.bf16.mxu0 %v797_v3  ;;  %v737_v20 = vpack.c.bf16 %v225_v14, %v224_v13  ;;  %v599_v21 = vld [vmem:[%s1011_s1] ss:$0 sm:$0xff]  ;;  %v731_v22 = vpack.c.bf16 %v128_v19, %v127_v18  ;;  %v400_v24 = vld [vmem:[%s1015_s5 + $0x8] sm:$0xff]  ;;  %vm227_vm4 = vcmask 326656  }
   0xa   :  { %735 = vmatpush3.bf16.msra.mxu0 %v734_v12  ;;  %678 = vmatprep.mubr.msk.f32.mxu0 %vm798_vm0, %v799_v5  ;;  %vm219_vm3 = vcmp.eq.s32.totalorder %v599_v21, %v37_v7  ;;  %v399_v23 = vld [vmem:[%s1015_s5] sm:$0xff]  ;;  %v401_v28 = vld [vmem:[%s1015_s5 + $0x10] sm:$0xff]  ;;  %v402_v29 = vld [vmem:[%s1015_s5 + $0x18] sm:$0xff]  ;;  %vm406_vm6 = vcmask 457728   ;;  %vm134_vm7 = vcmask 1040384   ;;  %v800_v38 = vmov 0  }
   0xb   :  { %736 = vmatprep.subr.bf16.mxu0 %v797_v3  ;;  %729 = vmatpush3.bf16.msra.mxu1 %v728_v17  ;;  %v226_v25 = vld [vmem:[%s1014_s4 + $0x20] sm:$0xff]  ;;  %v600_v26 = vsel %vm219_vm3, 1.0, %v799_v5  ;;  %v746_v27 = vpack.c.bf16 %v400_v24, %v399_v23  ;;  %v749_v30 = vpack.c.bf16 %v402_v29, %v401_v28  ;;  %v404_v32 = vld [vmem:[%s1015_s5 + $0x28] sm:$0xff]  ;;  %v405_v35 = vld [vmem:[%s1015_s5 + $0x30] sm:$0xff]  ;;  %vm130_vm8 = vcmask 269312   ;;  %s801_s27 = smov [#allocation2]  }
   0xc   :  { %730 = vmatprep.subr.bf16.mxu1 %v797_v3  ;;  %v403_v31 = vld [vmem:[%s1015_s5 + $0x20] sm:$0xff]  ;;  %765 = vset.pattern.permute.xlu0 %v800_v38  ;;  %v304_v40 = vld [vmem:[%s1017_s7 + $0x8] sm:$0xff]  ;;  %v305_v42 = vld [vmem:[%s1017_s7 + $0x10] sm:$0xff]  ;;  %s586_s28 = sshll.u32 %s801_s27, 4  ;;  %vm578_vm9 = vcmask 125952   ;;  %s587_s28 = int_to_ptr.vmem [resolvable:$true] %s586_s28 }
   0xd   :  { %v752_v33 = vpack.c.bf16 %v404_v32, %v403_v31  ;;  %v604_v34 = vld [vmem:[%s1012_s2] ss:$0 sm:$0xff]  ;;  %766 = vset.pattern.permute.xlu1 %v800_v38  ;;  %v306_v43 = vld [vmem:[%s1017_s7 + $0x18] sm:$0xff]  ;;  %v483_v49 = vld [vmem:[%s1018_s8 + $0x8] sm:$0xff]  ;;  %s773_s29 = scalar_lea.vmem %s587_s28, 64  ;;  %p778_p1 = scmp.lt.s32.totalorder %s587_s28, %s587_s28 }
   0xe   :  { %738 = vmatpush3.bf16.msra.mxu0 %v737_v20  ;;  %vm396_vm5 = vcmp.eq.s32.totalorder %v604_v34, %v37_v7  ;;  %v129_v37 = vld [vmem:[%s1016_s6 + $0x20] sm:$0x1]  ;;  %v743_v47 = vpack.c.bf16 %v306_v43, %v305_v42  ;;  %v484_v52 = vld [vmem:[%s1018_s8 + $0x10] sm:$0xff]  ;;  %v485_v53 = vld [vmem:[%s1018_s8 + $0x18] sm:$0xff]  ;;  %p774_p0 = scmp.ne.s32.totalorder %s587_s28, %s773_s29  ;;  %p779_p2 = scmp.lt.s32.totalorder %s773_s29, %s773_s29 }
   0xf   :  { %676 = vmatprep.subr.mxu0 %v799_v5  ;;  %732 = vmatpush3.bf16.msra.mxu1 %v731_v22  ;;  %v605_v36 = vsel %vm396_vm5, 1.0, %v799_v5  ;;  %v303_v39 = vld [vmem:[%s1017_s7] sm:$0xff]  ;;  %v758_v57 = vpack.c.bf16 %v485_v53, %v484_v52 }
  0x10   :  { %663 = vmatprep.subr.mxu1 %v799_v5  ;;  %v740_v41 = vpack.c.bf16 %v304_v40, %v303_v39  ;;  %v482_v48 = vld [vmem:[%s1018_s8] sm:$0xff]  ;;  %p780_p3 = por %p779_p2, %p778_p1 }
  0x11   :  { %v307_v50 = vld [vmem:[%s1017_s7 + $0x20] sm:$0x1]  ;;  %v755_v51 = vpack.c.bf16 %v483_v49, %v482_v48 }
  0x12   :  { %677 = vmatpush3.msra.mxu0 %v226_v25  ;;  %v486_v59 = vld [vmem:[%s1018_s8 + $0x20] sm:$0x1]  ;;  %p781_p4 = pnand %p780_p3, %p774_p0 }
  0x13   :  { %679 = vmatmul.mubr.msk.f32.vlgmr.msra.gmra.mrb[2].mxu0 %vm227_vm4, %v600_v26  ;;  %745 = vmatprep.subr.bf16.mxu0 %v797_v3  ;;  %v609_v14 = vld [vmem:[%s1019_s9] ss:$0 sm:$0xff] }
  0x14   :  { %747 = vmatpush3.bf16.msra.mxu0 %v746_v27  ;;  %708 = vmatprep.mubr.msk.f32.mxu0 %vm798_vm0, %v799_v5 }
  0x15   :  { %748 = vmatprep.subr.bf16.mxu0 %v797_v3  ;;  %664 = vmatpush3.msk.msra.mxu1 %vm134_vm7, %v129_v37 }
  0x16   :  { %739 = vmatprep.subr.bf16.mxu1 %v797_v3 }
  0x18   :  { %750 = vmatpush3.bf16.msra.mxu0 %v749_v30 }
  0x19   :  { %751 = vmatprep.subr.bf16.mxu0 %v797_v3 }
  0x1c   :  { %753 = vmatpush3.bf16.msra.mxu0 %v752_v33 }
  0x1d   :  { %706 = vmatprep.subr.mxu0 %v799_v5 }
  0x20   :  { %707 = vmatpush3.msra.mxu0 %v405_v35 }
  0x21   :  { %709 = vmatmul.mubr.msk.f32.vlgmr.msra.gmra.mrb[4].mxu0 %vm406_vm6, %v605_v36 }
  0xdc   :  { %v119_v44 = vpop.f32.mrb[0].mxu0 }
  0xdd   :  { %v123_v45 = vmax.f32 %v119_v44, 1.0  ;;  %v654_v46 = vpop.f32.mrb[1].mxu0  ;;  %666 = vmatmul.mubr.msk.f32.vlgmr.msra.gmra.mrb[0].mxu1 %vm130_vm8, %v119_v44 }
  0xde   :  { %741 = vmatpush3.bf16.msra.mxu1 %v740_v41  ;;  %691 = vmatprep.mubr.msk.f32.mxu1 %vm798_vm0, %v799_v5 }
  0xdf   :  { %767 = vrcp.f32 %v123_v45  ;;  %742 = vmatprep.subr.bf16.mxu1 %v797_v3 }
  0xe2   :  { %744 = vmatpush3.bf16.msra.mxu1 %v743_v47 }
  0xe3   :  { %689 = vmatprep.subr.mxu1 %v799_v5 }
  0xe6   :  { %v297_v54 = vpop.f32.mrb[2].mxu0  ;;  %690 = vmatpush3.msk.msra.mxu1 %vm134_vm7, %v307_v50 }
  0xe7   :  { %v301_v55 = vmax.f32 %v297_v54, 1.0  ;;  %v680_v56 = vpop.f32.mrb[3].mxu0  ;;  %692 = vmatmul.mubr.msk.f32.vlgmr.msra.gmra.mrb[2].mxu1 %vm130_vm8, %v297_v54  ;;  %754 = vmatprep.subr.bf16.mxu1 %v797_v3 }
  0xe8   :  { %756 = vmatpush3.bf16.msra.mxu1 %v755_v51  ;;  %721 = vmatprep.mubr.msk.f32.mxu1 %vm798_vm0, %v799_v5 }
  0xe9   :  { %v768_v58 = vpop.eup %767  ;;  %769 = vrcp.f32 %v301_v55  ;;  %757 = vmatprep.subr.bf16.mxu1 %v797_v3 }
  0xea   :  { %210 = vperm.xlu0 %765, %v768_v58  }
  0xec   :  { %759 = vmatpush3.bf16.msra.mxu1 %v758_v57 }
  0xed   :  { %719 = vmatprep.subr.mxu1 %v799_v5 }
  0xf0   :  { %720 = vmatpush3.msk.msra.mxu1 %vm134_vm7, %v486_v59 }
  0xf3   :  { %v770_v60 = vpop.eup %769 }
  0xf4   :  { %v476_v61 = vpop.f32.mrb[4].mxu0  ;;  %386 = vperm.xlu0 %765, %v770_v60  }
  0xf5   :  { %v480_v62 = vmax.f32 %v476_v61, 1.0  ;;  %v710_v63 = vpop.f32.mrb[5].mxu0  ;;  %722 = vmatmul.mubr.msk.f32.vlgmr.msra.gmra.mrb[4].mxu1 %vm130_vm8, %v476_v61 }
  0xf7   :  { %771 = vrcp.f32 %v480_v62 }
 0x101   :  { %v772_v0 = vpop.eup %771 }
 0x102   :  { %565 = vperm.xlu1 %766, %v772_v0  }
 0x169   :  { %v211_v3 = vpop.permute.xlu0 %210 }
 0x173   :  { %v387_v4 = vpop.permute.xlu0 %386 }
 0x181   :  { %v566_v10 = vpop.permute.xlu1 %565 }
 0x1b0   :  { %v204_v1 = vpop.f32.mrb[0].mxu1 }
 0x1b1   :  { %v667_v2 = vpop.f32.mrb[1].mxu1  ;;  %v213_v6 = vmul.f32 %v211_v3, %v204_v1 }
 0x1ba   :  { %v380_v5 = vpop.f32.mrb[2].mxu1 }
 0x1bb   :  { %v389_v7 = vmul.f32 %v387_v4, %v380_v5  ;;  %v693_v8 = vpop.f32.mrb[3].mxu1 }
 0x1bd   :  { %v390_v9 = vadd.f32 %v389_v7, %v213_v6 }
 0x1c8   :  { %v559_v11 = vpop.f32.mrb[4].mxu1 }
 0x1c9   :  { %v568_v12 = vmul.f32 %v566_v10, %v559_v11  ;;  %v723_v13 = vpop.f32.mrb[5].mxu1 }
 0x1cb   :  { %v569_v15 = vadd.f32 %v568_v12, %v390_v9 }
 0x1cd   :  { %v577_v16 = vadd.f32 %v609_v14, %v569_v15 }
 0x1cf   :  { %579 = vst.msk [vmem:[#allocation2] sm:$0xf] %vm578_vm9, %v577_v16 }
 0x1d0   :  { %784 = shalt.err (!%p781_p4)
}
 0x1d1   :  { %s785_s3 = scalar_lea.hbm %s1020_s10, 64 }
 0x1d2   :  { %p786_p5 = scmp.ne.s32.totalorder %s1020_s10, %s785_s3  ;;  %p789_p6 = scmp.lt.u32.totalorder %s785_s3, %s1020_s10 }
 0x1d4   :  { %p791_p7 = pnand %p789_p6, %p786_p5 }
 0x1d6   :  { %794 = shalt.err (!%p791_p7)
}
 0x1d7   :  { %589 = dma.vmem_to_hbm [thread:$0]  %s587_s28, 64, %s1020_s10, [#allocation3]  }
 0x1d8   :  { %795 = dma.done.wait [#allocation3], 64  }
 0x1d9   :  { %796 = vsyncadd [#allocation3], 4294967232 }
 0x1da   :  { %593 = vsyncpa [#allocation3], 1 }

</bundles_post_ra>
